<compile_context>
chip_gen: v7x
topology: tpu7x:2x2x1
jax: 0.10.0
libtpu: 0.0.40
codegen_flags: <defaults>
</compile_context>

<pallas_src>
import math

import jax
import jax.numpy as jnp
from jax.experimental import pallas as pl
from jax.experimental.pallas import tpu as pltpu


def _round_up(x: int, m: int) -> int:
    return ((x + m - 1) // m) * m


# ----------------------------------------------------------------------------
# Kernel: one batch tile, all DenseBlocks fused, features kept in registers.
# refs = (x_ref, w0, b0, w1, b1, ..., o_ref); each w is (C_i, 2F), b is (1, 2F).
# ----------------------------------------------------------------------------
def _tcblock_kernel(x_ref, *rest):
    *param_refs, o_ref = rest
    assert len(param_refs) % 2 == 0
    n_layers = len(param_refs) // 2
    filters = param_refs[1].shape[1] // 2  # bias is (1, 2*filters)

    feat = x_ref[...]  # (TM, C0) f32, in-register
    for i in range(n_layers):
        w = param_refs[2 * i][...]       # (C_i, 2F) -- fused [Wf | Wg]
        b = param_refs[2 * i + 1][...]   # (1, 2F)   -- fused [bf | bg]
        # Conv1d tap 0 always hits the zero left-pad (length-1 seq), so only
        # tap 1 contributes: one matmul per layer is the exact PyTorch result.
        y = jnp.dot(feat, w, preferred_element_type=jnp.float32) + b
        xf = y[:, :filters]
        xg = y[:, filters:]
        act = jnp.tanh(xf) * jax.nn.sigmoid(xg)
        feat = jnp.concatenate([feat, act], axis=1)

    # Single lane-dense store of the full (TM, C_out) tile.
    o_ref[...] = feat.astype(o_ref.dtype)


# ----------------------------------------------------------------------------
# Wrapper: batch-tiled pallas_call, weights resident across grid steps.
# ----------------------------------------------------------------------------
def tcblock_forward(x, layer_params, *, tm=512):
    """x: (N, in_filters) f32.
    layer_params: list of (w_fg, b_fg) per layer, w_fg (C_i, 2F), b_fg (1, 2F)."""
    n, c0 = x.shape
    filters = layer_params[0][1].shape[1] // 2
    c_out = c0 + len(layer_params) * filters

    # Batch tile: large for pipelining/megacore, but never larger than the
    # (sublane-rounded) batch itself.  Pad the batch so the grid divides evenly.
    tm_eff = min(tm, _round_up(n, 8))
    n_pad = _round_up(n, tm_eff)
    x_in = jnp.pad(x, ((0, n_pad - n), (0, 0))) if n_pad != n else x
    grid = (n_pad // tm_eff,)

    flat_params = []
    in_specs = [pl.BlockSpec((tm_eff, c0), lambda i: (i, 0))]
    for w, b in layer_params:
        flat_params.extend((w, b))
        in_specs.append(pl.BlockSpec(w.shape, lambda i: (0, 0)))  # resident
        in_specs.append(pl.BlockSpec(b.shape, lambda i: (0, 0)))  # resident

    out = pl.pallas_call(
        _tcblock_kernel,
        out_shape=jax.ShapeDtypeStruct((n_pad, c_out), jnp.float32),
        grid=grid,
        in_specs=in_specs,
        out_specs=pl.BlockSpec((tm_eff, c_out), lambda i: (i, 0)),
        compiler_params=pltpu.CompilerParams(
            dimension_semantics=("parallel",)),
    )(x_in, *flat_params)

    return out[:n] if n_pad != n else out


# ----------------------------------------------------------------------------
# Parameter construction mirroring TCBlock.__init__ (deterministic, synthetic).
# Conv1d weights are (out, in, kernel=2); only tap 1 is kept (tap 0 sees the
# zero pad).  f/g gates are packed into one weight / one bias per layer.
# ----------------------------------------------------------------------------
def init_tcblock_params(key, seq_len, in_filters, filters):
    no_layer = int(math.ceil(math.log2(seq_len)))
    params = []
    for i in range(no_layer):
        c_in = in_filters + i * filters
        fan_in = c_in * 2  # in_channels * kernel_size, PyTorch default init
        bound = 1.0 / math.sqrt(fan_in)
        key, k1, k2, k3, k4 = jax.random.split(key, 5)
        wf_full = jax.random.uniform(k1, (filters, c_in, 2), jnp.float32, -bound, bound)
        bf = jax.random.uniform(k2, (filters,), jnp.float32, -bound, bound)
        wg_full = jax.random.uniform(k3, (filters, c_in, 2), jnp.float32, -bound, bound)
        bg = jax.random.uniform(k4, (filters,), jnp.float32, -bound, bound)
        wf = jnp.transpose(wf_full[:, :, 1])  # (c_in, filters)
        wg = jnp.transpose(wg_full[:, :, 1])
        w_fg = jnp.concatenate([wf, wg], axis=1)                 # (c_in, 2F)
        b_fg = jnp.concatenate([bf, bg]).reshape(1, 2 * filters)  # (1, 2F)
        params.append((w_fg, b_fg))
    return params


def tcblock_reference(x, layer_params):
    """Pure-JAX reference of the PyTorch forward (for verification)."""
    filters = layer_params[0][1].shape[1] // 2
    cur = x
    for w, b in layer_params:
        y = cur @ w + b
        xf, xg = y[:, :filters], y[:, filters:]
        cur = jnp.concatenate([cur, jnp.tanh(xf) * jax.nn.sigmoid(xg)], axis=1)
    return cur


if __name__ == "__main__":
    # TCBlock(seq_len=8, in_filters=4, filters=8) -> ceil(log2(8)) = 3 DenseBlocks;
    # input (batch=2, in_filters=4), output (2, 4 + 3*8 = 28).
    seq_len, in_filters, filters, batch = 8, 4, 8, 2

    key = jax.random.PRNGKey(0)
    key, kx = jax.random.split(key)
    x = jax.random.normal(kx, (batch, in_filters), jnp.float32)
    params = init_tcblock_params(key, seq_len, in_filters, filters)

    out = jax.block_until_ready(tcblock_forward(x, params))

    ref = tcblock_reference(x, params)
    assert out.shape == ref.shape == (batch, in_filters + 3 * filters)
    assert jnp.allclose(out, ref, atol=1e-5, rtol=1e-5), "mismatch vs reference"

    print("KERNEL_OK")
</pallas_src>

<mosaic_0001>
module attributes {stable_mosaic.version = 11 : i64} {
  func.func @_tcblock_kernel(%arg0: i32, %arg1: memref<8x4xf32, #tpu.memory_space<vmem>>, %arg2: memref<4x16xf32, #tpu.memory_space<vmem>>, %arg3: memref<1x16xf32, #tpu.memory_space<vmem>>, %arg4: memref<12x16xf32, #tpu.memory_space<vmem>>, %arg5: memref<1x16xf32, #tpu.memory_space<vmem>>, %arg6: memref<20x16xf32, #tpu.memory_space<vmem>>, %arg7: memref<1x16xf32, #tpu.memory_space<vmem>>, %arg8: memref<8x28xf32, #tpu.memory_space<vmem>>) attributes {dimension_semantics = [#tpu.dimension_semantics<parallel>], iteration_bounds = array<i64: 1>, scalar_prefetch = 0 : i64, scratch_operands = 0 : i64, tpu.core_type = #tpu.core_type<tc>, window_params = [{transform_indices = @transform_0, window_bounds = array<i64: 8, 4>}, {pipeline_mode = #tpu.pipeline_mode<synchronous>, transform_indices = @transform_1, window_bounds = array<i64: 4, 16>}, {pipeline_mode = #tpu.pipeline_mode<synchronous>, transform_indices = @transform_2, window_bounds = array<i64: 1, 16>}, {pipeline_mode = #tpu.pipeline_mode<synchronous>, transform_indices = @transform_3, window_bounds = array<i64: 12, 16>}, {pipeline_mode = #tpu.pipeline_mode<synchronous>, transform_indices = @transform_4, window_bounds = array<i64: 1, 16>}, {pipeline_mode = #tpu.pipeline_mode<synchronous>, transform_indices = @transform_5, window_bounds = array<i64: 20, 16>}, {pipeline_mode = #tpu.pipeline_mode<synchronous>, transform_indices = @transform_6, window_bounds = array<i64: 1, 16>}, {transform_indices = @transform_7, window_bounds = array<i64: 8, 28>}]} {
    %c0 = arith.constant 0 : index
    %c0_0 = arith.constant 0 : index
    %0 = vector.load %arg1[%c0, %c0_0] : memref<8x4xf32, #tpu.memory_space<vmem>>, vector<8x4xf32>
    %c0_1 = arith.constant 0 : index
    %c0_2 = arith.constant 0 : index
    %1 = vector.load %arg2[%c0_1, %c0_2] : memref<4x16xf32, #tpu.memory_space<vmem>>, vector<4x16xf32>
    %c0_3 = arith.constant 0 : index
    %c0_4 = arith.constant 0 : index
    %2 = vector.load %arg3[%c0_3, %c0_4] : memref<1x16xf32, #tpu.memory_space<vmem>>, vector<1x16xf32>
    %cst = arith.constant dense<0.000000e+00> : vector<8x16xf32>
    %3 = tpu.matmul %0, %1, %cst {dimension_numbers = #tpu.dot_dimension_numbers<[1], [0], [0], [1], [0, 0, 1, 1], [], []>} : vector<8x4xf32>, vector<4x16xf32>, vector<8x16xf32> -> vector<8x16xf32>
    %4 = vector.broadcast %2 : vector<1x16xf32> to vector<8x16xf32>
    %5 = arith.addf %3, %4 : vector<8x16xf32>
    %6 = vector.extract_strided_slice %5 {offsets = [0, 0], sizes = [8, 8], strides = [1, 1]} : vector<8x16xf32> to vector<8x8xf32>
    %7 = vector.extract_strided_slice %5 {offsets = [0, 8], sizes = [8, 8], strides = [1, 1]} : vector<8x16xf32> to vector<8x8xf32>
    %8 = math.tanh %6 : vector<8x8xf32>
    %9 = arith.negf %7 : vector<8x8xf32>
    %10 = math.exp %9 : vector<8x8xf32>
    %cst_5 = arith.constant 1.000000e+00 : f32
    %11 = vector.broadcast %cst_5 : f32 to vector<8x8xf32>
    %12 = arith.addf %11, %10 : vector<8x8xf32>
    %13 = arith.divf %11, %12 : vector<8x8xf32>
    %14 = arith.mulf %8, %13 : vector<8x8xf32>
    %15 = tpu.concatenate %0, %14 in 1 : vector<8x4xf32>, vector<8x8xf32> -> vector<8x12xf32>
    %c0_6 = arith.constant 0 : index
    %c0_7 = arith.constant 0 : index
    %16 = vector.load %arg4[%c0_6, %c0_7] : memref<12x16xf32, #tpu.memory_space<vmem>>, vector<12x16xf32>
    %c0_8 = arith.constant 0 : index
    %c0_9 = arith.constant 0 : index
    %17 = vector.load %arg5[%c0_8, %c0_9] : memref<1x16xf32, #tpu.memory_space<vmem>>, vector<1x16xf32>
    %cst_10 = arith.constant dense<0.000000e+00> : vector<8x16xf32>
    %18 = tpu.matmul %15, %16, %cst_10 {dimension_numbers = #tpu.dot_dimension_numbers<[1], [0], [0], [1], [0, 0, 1, 1], [], []>} : vector<8x12xf32>, vector<12x16xf32>, vector<8x16xf32> -> vector<8x16xf32>
    %19 = vector.broadcast %17 : vector<1x16xf32> to vector<8x16xf32>
    %20 = arith.addf %18, %19 : vector<8x16xf32>
    %21 = vector.extract_strided_slice %20 {offsets = [0, 0], sizes = [8, 8], strides = [1, 1]} : vector<8x16xf32> to vector<8x8xf32>
    %22 = vector.extract_strided_slice %20 {offsets = [0, 8], sizes = [8, 8], strides = [1, 1]} : vector<8x16xf32> to vector<8x8xf32>
    %23 = math.tanh %21 : vector<8x8xf32>
    %24 = arith.negf %22 : vector<8x8xf32>
    %25 = math.exp %24 : vector<8x8xf32>
    %cst_11 = arith.constant 1.000000e+00 : f32
    %26 = vector.broadcast %cst_11 : f32 to vector<8x8xf32>
    %27 = arith.addf %26, %25 : vector<8x8xf32>
    %28 = arith.divf %26, %27 : vector<8x8xf32>
    %29 = arith.mulf %23, %28 : vector<8x8xf32>
    %30 = tpu.concatenate %15, %29 in 1 : vector<8x12xf32>, vector<8x8xf32> -> vector<8x20xf32>
    %c0_12 = arith.constant 0 : index
    %c0_13 = arith.constant 0 : index
    %31 = vector.load %arg6[%c0_12, %c0_13] : memref<20x16xf32, #tpu.memory_space<vmem>>, vector<20x16xf32>
    %c0_14 = arith.constant 0 : index
    %c0_15 = arith.constant 0 : index
    %32 = vector.load %arg7[%c0_14, %c0_15] : memref<1x16xf32, #tpu.memory_space<vmem>>, vector<1x16xf32>
    %cst_16 = arith.constant dense<0.000000e+00> : vector<8x16xf32>
    %33 = tpu.matmul %30, %31, %cst_16 {dimension_numbers = #tpu.dot_dimension_numbers<[1], [0], [0], [1], [0, 0, 1, 1], [], []>} : vector<8x20xf32>, vector<20x16xf32>, vector<8x16xf32> -> vector<8x16xf32>
    %34 = vector.broadcast %32 : vector<1x16xf32> to vector<8x16xf32>
    %35 = arith.addf %33, %34 : vector<8x16xf32>
    %36 = vector.extract_strided_slice %35 {offsets = [0, 0], sizes = [8, 8], strides = [1, 1]} : vector<8x16xf32> to vector<8x8xf32>
    %37 = vector.extract_strided_slice %35 {offsets = [0, 8], sizes = [8, 8], strides = [1, 1]} : vector<8x16xf32> to vector<8x8xf32>
    %38 = math.tanh %36 : vector<8x8xf32>
    %39 = arith.negf %37 : vector<8x8xf32>
    %40 = math.exp %39 : vector<8x8xf32>
    %cst_17 = arith.constant 1.000000e+00 : f32
    %41 = vector.broadcast %cst_17 : f32 to vector<8x8xf32>
    %42 = arith.addf %41, %40 : vector<8x8xf32>
    %43 = arith.divf %41, %42 : vector<8x8xf32>
    %44 = arith.mulf %38, %43 : vector<8x8xf32>
    %45 = tpu.concatenate %30, %44 in 1 : vector<8x20xf32>, vector<8x8xf32> -> vector<8x28xf32>
    %c0_18 = arith.constant 0 : index
    %c0_19 = arith.constant 0 : index
    %46 = vector.load %arg8[%c0_18, %c0_19] : memref<8x28xf32, #tpu.memory_space<vmem>>, vector<8x28xf32>
    tpu.vector_store %arg8[%c0_18, %c0_19], %45 {strides = array<i32>} : memref<8x28xf32, #tpu.memory_space<vmem>>, vector<8x28xf32>,
    return
  }
  func.func @transform_0(%arg0: i32) -> (i32, i32) {
    %c0_i32 = arith.constant 0 : i32
    %c0_i32_0 = arith.constant 0 : i32
    return %arg0, %c0_i32 : i32, i32
  }
  func.func @transform_1(%arg0: i32) -> (i32, i32) {
    %c0_i32 = arith.constant 0 : i32
    %c0_i32_0 = arith.constant 0 : i32
    %c0_i32_1 = arith.constant 0 : i32
    return %c0_i32, %c0_i32_0 : i32, i32
  }
  func.func @transform_2(%arg0: i32) -> (i32, i32) {
    %c0_i32 = arith.constant 0 : i32
    %c0_i32_0 = arith.constant 0 : i32
    %c0_i32_1 = arith.constant 0 : i32
    return %c0_i32, %c0_i32_0 : i32, i32
  }
  func.func @transform_3(%arg0: i32) -> (i32, i32) {
    %c0_i32 = arith.constant 0 : i32
    %c0_i32_0 = arith.constant 0 : i32
    %c0_i32_1 = arith.constant 0 : i32
    return %c0_i32, %c0_i32_0 : i32, i32
  }
  func.func @transform_4(%arg0: i32) -> (i32, i32) {
    %c0_i32 = arith.constant 0 : i32
    %c0_i32_0 = arith.constant 0 : i32
    %c0_i32_1 = arith.constant 0 : i32
    return %c0_i32, %c0_i32_0 : i32, i32
  }
  func.func @transform_5(%arg0: i32) -> (i32, i32) {
    %c0_i32 = arith.constant 0 : i32
    %c0_i32_0 = arith.constant 0 : i32
    %c0_i32_1 = arith.constant 0 : i32
    return %c0_i32, %c0_i32_0 : i32, i32
  }
  func.func @transform_6(%arg0: i32) -> (i32, i32) {
    %c0_i32 = arith.constant 0 : i32
    %c0_i32_0 = arith.constant 0 : i32
    %c0_i32_1 = arith.constant 0 : i32
    return %c0_i32, %c0_i32_0 : i32, i32
  }
  func.func @transform_7(%arg0: i32) -> (i32, i32) {
    %c0_i32 = arith.constant 0 : i32
    %c0_i32_0 = arith.constant 0 : i32
    return %arg0, %c0_i32 : i32, i32
  }
}

</mosaic_0001>

<bundles_post_ra>
// kernel: tpu_custom_call.1
= control target key start
LH: loop header
LB: loop body
LE: loop exit
PB: predicated region body
PF: predicated region fallthrough
CT: control target
= control target key end

     0   :  { %vm40_vm0 = vcmask 1043456   ;;  %v454_v1 = vmov 0.0   ;;  %vm455_vm1 = vmmov 0   ;;  %vm36_vm2 = vcmask 31744   ;;  %s557_s0 = inlined_call_operand.vmem [shape: f32[8,4], index: 0, kind: input, shape index: {}]   ;;  %s558_s1 = inlined_call_operand.vmem [shape: f32[4,16], index: 1, kind: input, shape index: {}]   ;;  %s559_s2 = inlined_call_operand.vmem [shape: f32[1,16], index: 2, kind: input, shape index: {}]   ;;  %s560_s3 = inlined_call_operand.vmem [shape: f32[12,16], index: 3, kind: input, shape index: {}]   ;;  %s561_s4 = inlined_call_operand.vmem [shape: f32[1,16], index: 4, kind: input, shape index: {}]   ;;  %s562_s5 = inlined_call_operand.vmem [shape: f32[20,16], index: 5, kind: input, shape index: {}]   ;;  %s563_s6 = inlined_call_operand.vmem [shape: f32[1,16], index: 6, kind: input, shape index: {}]   ;;  %s564_s7 = inlined_call_operand.hbm [shape: f32[8,28], index: 7, kind: output, shape index: {}]  }
   0x1   :  { %v28_v0 = vld [vmem:[%s558_s1] sm:$0xf]  ;;  %375 = vmatprep.subr.mxu1 %v454_v1  ;;  %377 = vmatprep.mubr.msk.f32.mxu1 %vm455_vm1, %v454_v1 }
   0x2   :  { %v27_v2 = vld [vmem:[%s557_s0] sm:$0xff]  ;;  %376 = vmatpush3.msk.msra.mxu1 %vm40_vm0, %v28_v0  ;;  %393 = vmatprep.mubr.msk.f32.mxu0 %vm455_vm1, %v454_v1 }
   0x3   :  { %12 = vsyncpa [#allocation3], 0  ;;  %378 = vmatmul.mubr.msk.f32.vlgmr.msra.gmra.mrb[0].mxu1 %vm36_vm2, %v27_v2  ;;  %v354_v3 = vld [vmem:[%s559_s2] ss:$0 sm:$0xff]  ;;  %vm456_vm3 = vmmov 1   ;;  %v457_v12 = vmov 0.0|0.0  }
   0x4   :  { %384 = vmatprep.mubr.msk.f32.mxu1 %vm455_vm1, %v454_v1  ;;  %vm398_vm4 = vmpackc.low %vm40_vm0, %vm456_vm3  ;;  %v131_v10 = vld [vmem:[%s560_s3] sm:$0xff]  ;;  %v132_v11 = vld [vmem:[%s560_s3 + $0x8] sm:$0xf]  ;;  %396 = vmatprep.subr.bf16.mxu1 %v457_v12  ;;  %s458_s2 = smov 120   ;;  %s459_s9 = smov 4   ;;  %vm140_vm5 = vcmask 97280  }
   0x5   :  { %v397_v13 = vpack.c.bf16 %v132_v11, %v131_v10  ;;  %400 = vmatprep.subr.bf16.mxu0 %v457_v12  ;;  %v358_v20 = vld [vmem:[%s561_s4] ss:$0 sm:$0xff]  ;;  %v235_v28 = vld [vmem:[%s562_s5 + $0x8] sm:$0xff]  ;;  %v236_v31 = vld [vmem:[%s562_s5 + $0x10] sm:$0xf]  ;;  %s460_s16 = smov 12  }
   0x6   :  { %v234_v27 = vld [vmem:[%s562_s5] sm:$0xff]  ;;  %vm244_vm6 = vcmask 162816   ;;  %s461_s5 = smov 20   ;;  %s462_s19 = smov [#allocation2]   ;;  %vm338_vm7 = vcmask 228352  }
   0x7   :  { %399 = vmatpush3.bf16.msk.msra.mxu1 %vm398_vm4, %v397_v13  ;;  %v401_v29 = vpack.c.bf16 %v235_v28, %v234_v27  ;;  %v362_v37 = vld [vmem:[%s563_s6] ss:$0 sm:$0xff]  ;;  %s346_s20 = sshll.u32 %s462_s19, 4  ;;  %s347_s20 = int_to_ptr.vmem [resolvable:$true] %s346_s20 }
   0x8   :  { %s430_s6 = scalar_lea.vmem %s347_s20, 128  ;;  %p435_p1 = scmp.lt.s32.totalorder %s347_s20, %s347_s20 }
   0x9   :  { %402 = vmatpush3.bf16.msra.mxu0 %v401_v29  ;;  %p431_p0 = scmp.ne.s32.totalorder %s347_s20, %s430_s6  ;;  %p436_p2 = scmp.lt.s32.totalorder %s430_s6, %s430_s6 }
   0xa   :  { %391 = vmatprep.subr.mxu0 %v454_v1 }
   0xb   :  { %p437_p3 = por %p436_p2, %p435_p1 }
   0xd   :  { %392 = vmatpush3.msk.msra.mxu0 %vm40_vm0, %v236_v31  ;;  %p438_p4 = pnand %p437_p3, %p431_p0 }
  0xd6   :  { %v110_v4 = vpop.f32.mrb[0].mxu1 }
  0xd7   :  { %v111_v5 = vadd.f32 %v354_v3, %v110_v4  ;;  %v379_v6 = vpop.f32.mrb[1].mxu1 }
  0xd9   :  { %v357_v7 = vmul.f32 -1.442695, %v111_v5 }
  0xdb   :  { %412 = vpow2.f32 %v357_v7 }
  0xe5   :  { %v413_v8 = vpop.eup %412 }
  0xe6   :  { %v118_v9 = vadd.f32 1.0, %v413_v8 }
  0xe8   :  { %414 = vrcp.f32 %v118_v9 }
  0xe9   :  { %416 = vtanh.f32 %v111_v5 }
  0xf2   :  { %v415_v14 = vpop.eup %414 }
  0xf3   :  { %122 = vrot.lane.b32.xlu0 %v415_v14, %s458_s2  ;;  %v417_v15 = vpop.eup %416 }
 0x165   :  { %v123_v16 = vpop.permute.xlu0 %122 }
 0x166   :  { %v125_v17 = vmul.f32 %v417_v15, %v123_v16 }
 0x168   :  { %127 = vrot.lane.b32.xlu0 %v125_v17, %s459_s9 }
 0x1da   :  { %v128_v18 = vpop.permute.xlu0 %127 }
 0x1db   :  { %v130_v19 = vsel %vm36_vm2, %v27_v2, %v128_v18 }
 0x1dc   :  { %385 = vmatmul.mubr.msk.f32.vlgmr.msra.gmra.mrb[2].mxu1 %vm140_vm5, %v130_v19 }
 0x2af   :  { %v213_v21 = vpop.f32.mrb[2].mxu1 }
 0x2b0   :  { %v214_v22 = vadd.f32 %v358_v20, %v213_v21  ;;  %v386_v23 = vpop.f32.mrb[3].mxu1 }
 0x2b2   :  { %v361_v24 = vmul.f32 -1.442695, %v214_v22 }
 0x2b4   :  { %418 = vpow2.f32 %v361_v24 }
 0x2be   :  { %v419_v25 = vpop.eup %418 }
 0x2bf   :  { %v221_v26 = vadd.f32 1.0, %v419_v25 }
 0x2c1   :  { %420 = vrcp.f32 %v221_v26 }
 0x2c2   :  { %422 = vtanh.f32 %v214_v22 }
 0x2cb   :  { %v421_v30 = vpop.eup %420 }
 0x2cc   :  { %225 = vrot.lane.b32.xlu1 %v421_v30, %s458_s2  ;;  %v423_v32 = vpop.eup %422 }
 0x33e   :  { %v226_v33 = vpop.permute.xlu1 %225 }
 0x33f   :  { %v228_v34 = vmul.f32 %v423_v32, %v226_v33 }
 0x341   :  { %230 = vrot.lane.b32.xlu1 %v228_v34, %s460_s16 }
 0x3b3   :  { %v231_v35 = vpop.permute.xlu1 %230 }
 0x3b4   :  { %v233_v36 = vsel %vm140_vm5, %v130_v19, %v231_v35 }
 0x3b5   :  { %394 = vmatmul.mubr.msk.f32.vlgmr.msra.gmra.mrb[0].mxu0 %vm244_vm6, %v233_v36 }
 0x488   :  { %v317_v38 = vpop.f32.mrb[0].mxu0 }
 0x489   :  { %v318_v39 = vadd.f32 %v362_v37, %v317_v38  ;;  %v395_v40 = vpop.f32.mrb[1].mxu0 }
 0x48b   :  { %v365_v41 = vmul.f32 -1.442695, %v318_v39 }
 0x48d   :  { %424 = vpow2.f32 %v365_v41 }
 0x497   :  { %v425_v42 = vpop.eup %424 }
 0x498   :  { %v325_v43 = vadd.f32 1.0, %v425_v42 }
 0x49a   :  { %426 = vrcp.f32 %v325_v43 }
 0x49b   :  { %428 = vtanh.f32 %v318_v39 }
 0x4a4   :  { %v427_v44 = vpop.eup %426 }
 0x4a5   :  { %329 = vrot.lane.b32.xlu0 %v427_v44, %s458_s2  ;;  %v429_v45 = vpop.eup %428 }
 0x517   :  { %v330_v46 = vpop.permute.xlu0 %329 }
 0x518   :  { %v332_v47 = vmul.f32 %v429_v45, %v330_v46 }
 0x51a   :  { %334 = vrot.lane.b32.xlu1 %v332_v47, %s461_s5 }
 0x58c   :  { %v335_v48 = vpop.permute.xlu1 %334 }
 0x58d   :  { %v337_v49 = vsel %vm244_vm6, %v233_v36, %v335_v48 }
 0x58e   :  { %339 = vst.msk [vmem:[#allocation2] sm:$0xff] %vm338_vm7, %v337_v49 }
 0x58f   :  { %441 = shalt.err (!%p438_p4)
}
 0x590   :  { %s442_s23 = scalar_lea.hbm %s564_s7, 128 }
 0x591   :  { %p443_p5 = scmp.ne.s32.totalorder %s564_s7, %s442_s23  ;;  %p446_p6 = scmp.lt.u32.totalorder %s442_s23, %s564_s7 }
 0x593   :  { %p448_p7 = pnand %p446_p6, %p443_p5 }
 0x595   :  { %451 = shalt.err (!%p448_p7)
}
 0x596   :  { %349 = dma.vmem_to_hbm [thread:$0]  %s347_s20, 128, %s564_s7, [#allocation3]  }
 0x597   :  { %452 = dma.done.wait [#allocation3], 128  }
 0x598   :  { %453 = vsyncadd [#allocation3], 4294967168 }
 0x599   :  { %353 = vsyncpa [#allocation3], 1 }

</bundles_post_ra>
